<compile_context>
chip_gen: v5e
topology: v5e:2x2
jax: 0.10.0
libtpu: 0.0.40
codegen_flags: <defaults>
</compile_context>

<pallas_src>
import functools

import jax
import jax.numpy as jnp
import numpy as np
from jax.experimental import pallas as pl
from jax.experimental.pallas import tpu as pltpu

NOISE_SIGMA = 1.0          # forward() hard-codes noise_sigma = 1 (multiply folded)

_LANES = 1024              # lane-dense column width (multiple of 128)
_FAST_PATH_ELEMS = 65536   # below this a fused XLA add beats kernel launch overhead


def _round_up(x, m):
    return ((x + m - 1) // m) * m


def _on_tpu():
    try:
        return jax.devices()[0].platform == "tpu"
    except Exception:
        return False


@functools.lru_cache(maxsize=1)
def _hw_tile_params():
    """(base_row_tile, vmem_limit_bytes) tuned per TPU generation."""
    # Conservative default works everywhere (v7x has only 64 MiB physical VMEM):
    # 1024 rows x 1024 lanes f32 = 4 MiB/slab; 3 slabs double-buffered ~ 24 MiB.
    row_tile, vmem_limit = 1024, 32 * 1024 * 1024
    try:
        info = pltpu.get_tpu_info()
        if getattr(info, "vmem_capacity_bytes", 0) >= 100 * 1024 * 1024:
            # v5e / v6e: 128 MiB physical VMEM -> bigger tiles, fewer grid steps.
            row_tile, vmem_limit = 2048, 64 * 1024 * 1024
    except Exception:
        pass
    return row_tile, vmem_limit


def _sublane_multiple(*dtypes):
    """Row-tile multiple respecting sublane packing of the narrowest dtype."""
    mult = 8
    for dt in dtypes:
        bits = np.dtype(dt).itemsize * 8
        if bits < 32:
            mult = max(mult, 8 * (32 // bits))
    return mult


def _row_tile_for(rows, base_row_tile, sub):
    """Pick a row tile: multiple of `sub`, <= base, and >= 2 grid steps."""
    if rows <= sub:
        return rows  # single full-extent block (block dim == array dim is legal)
    row_tile = min(base_row_tile, _round_up(rows, sub))
    if row_tile >= rows:
        # Split into >= 2 blocks so the "parallel" axis can shard across the
        # two TensorCores of a v7x megacore (free on v5e/v6e).
        row_tile = _round_up(pl.cdiv(rows, 2), sub)
    return row_tile


def _to_slab(flat, lanes):
    """Pad a flat array to a multiple of `lanes` and reshape to (rows, lanes)."""
    n = flat.shape[0]
    pad = (-n) % lanes
    if pad:
        flat = jnp.pad(flat, (0, pad))
    return flat.reshape(-1, lanes)


# -----------------------------------------------------------------------------
# Kernels
# -----------------------------------------------------------------------------
def _add_noise_kernel(proj_ref, noise_ref, out_ref):
    # noise_sigma == 1; any dtype cast happens on the VPU (free in mem-bound op).
    out_ref[...] = proj_ref[...] + noise_ref[...].astype(out_ref.dtype)


def _add_randn_kernel(seed_ref, proj_ref, out_ref):
    # Per-tile seed so every grid step (and each TensorCore) draws distinct noise.
    pltpu.prng_seed(seed_ref[0] + pl.program_id(0))
    noise = pltpu.stateful_normal(proj_ref.shape, jnp.float32)
    out_ref[...] = proj_ref[...] + noise.astype(out_ref.dtype)


# -----------------------------------------------------------------------------
# Wrappers
# -----------------------------------------------------------------------------
def _add_noise(proj, noise):
    """out = proj + noise, streamed through a lane-dense tiled Pallas kernel."""
    shape, dtype = proj.shape, proj.dtype
    n = int(np.prod(shape))

    if n < _FAST_PATH_ELEMS:
        # Launch/flatten machinery would dominate; fused XLA add is faster.
        return proj + noise.astype(dtype)

    base_row_tile, vmem_limit = _hw_tile_params()
    lanes = _LANES if n >= _LANES else _round_up(n, 128)

    proj2d = _to_slab(proj.reshape(-1), lanes)
    noise2d = _to_slab(noise.reshape(-1), lanes)
    rows = proj2d.shape[0]
    row_tile = _row_tile_for(rows, base_row_tile,
                             _sublane_multiple(dtype, noise.dtype))

    out2d = pl.pallas_call(
        _add_noise_kernel,
        out_shape=jax.ShapeDtypeStruct((rows, lanes), dtype),
        grid=(pl.cdiv(rows, row_tile),),
        in_specs=[
            pl.BlockSpec((row_tile, lanes), lambda i: (i, 0)),
            pl.BlockSpec((row_tile, lanes), lambda i: (i, 0)),
        ],
        out_specs=pl.BlockSpec((row_tile, lanes), lambda i: (i, 0)),
        compiler_params=pltpu.CompilerParams(
            dimension_semantics=("parallel",),
            vmem_limit_bytes=vmem_limit,
        ),
    )(proj2d, noise2d)

    flat_out = out2d.reshape(-1)
    if flat_out.shape[0] != n:
        flat_out = flat_out[:n]
    return flat_out.reshape(shape)


def _add_randn(proj, seed_arr):
    """out = proj + N(0,1) generated on-chip (no noise array ever hits HBM)."""
    shape, dtype = proj.shape, proj.dtype
    n = int(np.prod(shape))

    base_row_tile, vmem_limit = _hw_tile_params()
    lanes = _LANES if n >= _LANES else _round_up(n, 128)

    proj2d = _to_slab(proj.reshape(-1), lanes)
    rows = proj2d.shape[0]
    row_tile = _row_tile_for(rows, base_row_tile, _sublane_multiple(dtype))

    out2d = pl.pallas_call(
        _add_randn_kernel,
        out_shape=jax.ShapeDtypeStruct((rows, lanes), dtype),
        grid_spec=pltpu.PrefetchScalarGridSpec(
            num_scalar_prefetch=1,
            grid=(pl.cdiv(rows, row_tile),),
            in_specs=[pl.BlockSpec((row_tile, lanes), lambda i, seed: (i, 0))],
            out_specs=pl.BlockSpec((row_tile, lanes), lambda i, seed: (i, 0)),
        ),
        compiler_params=pltpu.CompilerParams(
            dimension_semantics=("parallel",),
            vmem_limit_bytes=vmem_limit,
        ),
    )(seed_arr, proj2d)

    flat_out = out2d.reshape(-1)
    if flat_out.shape[0] != n:
        flat_out = flat_out[:n]
    return flat_out.reshape(shape)


# -----------------------------------------------------------------------------
# Module wrapper
# -----------------------------------------------------------------------------
class Noise:
    """JAX/Pallas port of the PyTorch Noise module (additive white gaussian noise)."""

    def __init__(self, config=None):
        # nn.Parameter(torch.Tensor([0])) -- deterministic init, unused in forward.
        self.scalar = jnp.zeros((1,), dtype=jnp.float32)
        # Internal key used when no explicit key is supplied.
        # NOTE: this stateful split is NOT jit-safe; pass an explicit `key`
        # when calling under jit to guarantee fresh noise every call.
        self._key = jax.random.PRNGKey(0)

    def __call__(self, proj, noise_params=None, key=None):
        if noise_params is not None:
            if "noise" in noise_params:
                return _add_noise(proj, noise_params["noise"])
            # PyTorch leaves `out` undefined in this branch (would raise); mirror it.
            raise KeyError("noise_params provided but has no 'noise' entry")

        # torch.randn_like(proj) path.
        if key is None:
            self._key, key = jax.random.split(self._key)

        n = int(np.prod(proj.shape))
        if (not _on_tpu()) or n < _FAST_PATH_ELEMS:
            # Portable / tiny-input path: materialized normal + fused XLA add.
            noise = jax.random.normal(key, proj.shape, dtype=proj.dtype)
            return proj + NOISE_SIGMA * noise

        # Fused on-chip PRNG path: ~2N bytes of HBM traffic instead of ~4N.
        seed = jax.random.randint(key, (1,), 0, np.iinfo(np.int32).max,
                                  dtype=jnp.int32)
        try:
            return _add_randn(proj, seed)
        except Exception:
            # Fallback (e.g. interpret mode where the TPU PRNG does not lower).
            noise = jax.random.normal(key, proj.shape, dtype=proj.dtype)
            return _add_noise(proj, noise)


# -----------------------------------------------------------------------------
# Demo / self-test
# -----------------------------------------------------------------------------
if __name__ == "__main__":
    root = jax.random.PRNGKey(0)
    k_proj, k_noise, k_proj2, k_noise2, k_proj3, k_noise3, k_rand = \
        jax.random.split(root, 7)

    module = Noise(config=None)

    # Path 1a: explicit noise, small input (2,1,16,16) -> XLA fast path.
    proj_s = jax.random.normal(k_proj, (2, 1, 16, 16), dtype=jnp.float32)
    noise_s = jax.random.normal(k_noise, (2, 1, 16, 16), dtype=jnp.float32)
    out_s = jax.block_until_ready(module(proj_s, {"noise": noise_s}))
    np.testing.assert_allclose(np.asarray(out_s),
                               np.asarray(proj_s + NOISE_SIGMA * noise_s),
                               rtol=1e-6, atol=1e-6)

    # Path 1b: explicit noise, large input -> Pallas kernel, no padding,
    # ragged last row-block, >= 2 grid steps.
    proj_b = jax.random.normal(k_proj2, (2, 1, 192, 192), dtype=jnp.float32)
    noise_b = jax.random.normal(k_noise2, (2, 1, 192, 192), dtype=jnp.float32)
    out_b = jax.block_until_ready(module(proj_b, {"noise": noise_b}))
    np.testing.assert_allclose(np.asarray(out_b),
                               np.asarray(proj_b + NOISE_SIGMA * noise_b),
                               rtol=1e-6, atol=1e-6)

    # Path 1c: explicit noise, size not a multiple of the lane width
    # (exercises the minimal pad + output-slice path).
    proj_r = jax.random.normal(k_proj3, (2, 1, 200, 200), dtype=jnp.float32)
    noise_r = jax.random.normal(k_noise3, (2, 1, 200, 200), dtype=jnp.float32)
    out_r = jax.block_until_ready(module(proj_r, {"noise": noise_r}))
    np.testing.assert_allclose(np.asarray(out_r),
                               np.asarray(proj_r + NOISE_SIGMA * noise_r),
                               rtol=1e-6, atol=1e-6)

    # Path 2a: randn_like, small input -> portable fast path.
    out_rs = jax.block_until_ready(module(proj_s, None, key=k_rand))
    assert out_rs.shape == proj_s.shape and out_rs.dtype == proj_s.dtype
    assert bool(jnp.all(jnp.isfinite(out_rs)))

    # Path 2b: randn_like, large input -> fused on-chip PRNG kernel.
    proj_big = jax.random.normal(k_proj2, (2, 1, 256, 256), dtype=jnp.float32)
    out_rand = jax.block_until_ready(module(proj_big, None, key=k_rand))
    assert out_rand.shape == proj_big.shape and out_rand.dtype == proj_big.dtype
    assert bool(jnp.all(jnp.isfinite(out_rand)))
    added = np.asarray(out_rand - proj_big).reshape(-1)
    assert 0.5 < float(added.std()) < 2.0          # ~unit-variance noise
    assert abs(float(added.mean())) < 0.05         # ~zero-mean noise
    half = added.size // 2
    assert not np.allclose(added[:half], added[half:])  # per-tile seeds differ

    print("KERNEL_OK")
</pallas_src>

<mosaic_0001>
module attributes {stable_mosaic.version = 11 : i64} {
  func.func @_add_noise_kernel(%arg0: i32, %arg1: memref<40x1024xf32, #tpu.memory_space<vmem>>, %arg2: memref<40x1024xf32, #tpu.memory_space<vmem>>, %arg3: memref<40x1024xf32, #tpu.memory_space<vmem>>) attributes {dimension_semantics = [#tpu.dimension_semantics<parallel>], iteration_bounds = array<i64: 2>, scalar_prefetch = 0 : i64, scratch_operands = 0 : i64, tpu.core_type = #tpu.core_type<tc>, window_params = [{transform_indices = @transform_0, window_bounds = array<i64: 40, 1024>}, {transform_indices = @transform_1, window_bounds = array<i64: 40, 1024>}, {transform_indices = @transform_2, window_bounds = array<i64: 40, 1024>}]} {
    %c0 = arith.constant 0 : index
    %c0_0 = arith.constant 0 : index
    %0 = vector.load %arg1[%c0, %c0_0] : memref<40x1024xf32, #tpu.memory_space<vmem>>, vector<40x1024xf32>
    %c0_1 = arith.constant 0 : index
    %c0_2 = arith.constant 0 : index
    %1 = vector.load %arg2[%c0_1, %c0_2] : memref<40x1024xf32, #tpu.memory_space<vmem>>, vector<40x1024xf32>
    %2 = arith.addf %0, %1 : vector<40x1024xf32>
    %c0_3 = arith.constant 0 : index
    %c0_4 = arith.constant 0 : index
    %3 = vector.load %arg3[%c0_3, %c0_4] : memref<40x1024xf32, #tpu.memory_space<vmem>>, vector<40x1024xf32>
    tpu.vector_store %arg3[%c0_3, %c0_4], %2 {strides = array<i32>} : memref<40x1024xf32, #tpu.memory_space<vmem>>, vector<40x1024xf32>,
    return
  }
  func.func @transform_0(%arg0: i32) -> (i32, i32) {
    %c0_i32 = arith.constant 0 : i32
    %c0_i32_0 = arith.constant 0 : i32
    return %arg0, %c0_i32 : i32, i32
  }
  func.func @transform_1(%arg0: i32) -> (i32, i32) {
    %c0_i32 = arith.constant 0 : i32
    %c0_i32_0 = arith.constant 0 : i32
    return %arg0, %c0_i32 : i32, i32
  }
  func.func @transform_2(%arg0: i32) -> (i32, i32) {
    %c0_i32 = arith.constant 0 : i32
    %c0_i32_0 = arith.constant 0 : i32
    return %arg0, %c0_i32 : i32, i32
  }
}

</mosaic_0001>

<bundles_post_ra>
// kernel: tpu_custom_call.1
= control target key start
LH: loop header
LB: loop body
LE: loop exit
PB: predicated region body
PF: predicated region fallthrough
CT: control target
= control target key end

     0   :  { %7 = vsyncpa [#allocation3], 0  ;;  %s1154_s0 = inlined_call_operand.hbm [shape: f32[72,1024], index: 0, kind: input, shape index: {}]   ;;  %s1155_s1 = inlined_call_operand.hbm [shape: f32[72,1024], index: 1, kind: input, shape index: {}]   ;;  %s1156_s2 = inlined_call_operand.hbm [shape: f32[72,1024], index: 2, kind: output, shape index: {}]  }
   0x1   :  { %9 = vsyncpa [#allocation3 + $0x1], 0 }
   0x2   :  { %10 = vsyncpa [#allocation6], 0 }
   0x3   :  { %12 = vsyncpa [#allocation6 + $0x1], 0 }
   0x4   :  { %13 = vsyncpa [#allocation4], 0 }
   0x5   :  { %15 = vsyncpa [#allocation4 + $0x1], 0  ;;  %s796_s9 = smov 0   ;;  %s798_s10 = smov 0  }
   0x6   :  { %s800_s11 = smov 0   ;;  %s802_s12 = smov 0  }
   0x7 LB: > { %s817_s13 = sadd.s32 4294967295, %s770_s12   ;;  %s523_s14 = sadd.s32 4294967294, %s770_s12   ;;  %s770_s12 = sphi %s802_s12, %s1170_s12   ;;  %s766_s11 = sphi %s800_s11, %s1169_s11   ;;  %s762_s10 = sphi %s798_s10, %s1168_s10   ;;  %s758_s9 = sphi %s796_s9, %s1167_s9  }
   0x8   : > { %s821_s15 = sadd.s32 1, %s770_s12   ;;  %s28_s16 = sadd.s32 1, %s766_s11 }
   0x9   : > { %s25_s17 = ssub.s32 %s770_s12, %s821_s15  ;;  %p35_p0 = scmp.ne.s32.totalorder %s766_s11, %s762_s10 }
   0xa   : > { %p26_p1 = scmp.eq.s32.totalorder %s25_s17, 0  ;;  %p36_p2 = scmp.eq.s32.totalorder %s770_s12, 0 }
   0xb   : > { %p41_p3 = scmp.ne.s32.totalorder %s762_s10, %s758_s9  ;;  %p42_p4 = scmp.eq.s32.totalorder %s817_s13, 0 }
   0xc   : > { %s833_s18 = scalar_select %p26_p1, %s766_s11, %s28_s16  }
   0xd   : > { %p835_p5 = por %p36_p2, %p35_p0  ;;  %p839_p6 = por %p42_p4, %p41_p3 }
   0xe   : > { %p91_p7 = scmp.eq.s32.totalorder %s817_s13, 1  ;;  %p97_p8 = scmp.eq.s32.totalorder %s523_s14, 1 }
   0xf   : > { %p1157_p11 = scmp.ge.s32.totalorder %s770_s12, 2 }
  0x10   : > { %p844_p9 = por %p91_p7, %p35_p0  ;;  %p848_p10 = por %p97_p8, %p41_p3 }
  0x11   : > { %113 = sbr.rel (%p1157_p11) target bundleno = 98 (0x62), region = 16 }
  0x12   : > { %s1161_s22 = scalar_select %p848_p10, 1, 0 }
  0x16   : > { %116 = sbr.rel (!%p835_p5) target bundleno = 60 (0x3c), region = 20  ;;  %s117_s23 = sand.u32 (%p835_p5), 1, %s766_s11  }
  0x17   : > { %s122_s24 = smul.u32 (%p835_p5), 5, %s770_s12  ;;  %s862_s30 = scalar_lea.sflag (%p835_p5), [#allocation3], %s117_s23 }
  0x18   : > { %s562_s25 = smul.u32 (%p835_p5), 320, %s117_s23 }
  0x19   : > { %s123_s26 = ssub.s32 (%p835_p5), 9, %s122_s24 }
  0x1a   : > { %p124_p12 = scmp.lt.s32.totalorder (%p835_p5), %s123_s26, 5  ;;  %s121_s3 = scalar_lea.vmem (%p835_p5), [#allocation2], %s562_s25 }
  0x1c   : > { %s1172_s26 = smov (!%p124_p12, %s123_s26), 5 }
  0x1d   : > { %s550_s27 = sshll.u32 %s1172_s26, 6 }
  0x1e   : > { %s128_s28 = ssub.s32 320, %s550_s27 }
  0x1f   : > { %s129_s29 = sshll.u32 %s128_s28, 4 }
  0x20   : > { %130 = vsyncadd %s862_s30, %s129_s29  ;;  %p865_p13 = scmp.ne.s32.totalorder %s550_s27, 0  ;;  %s559_s5 = smul.u32 320, %s770_s12 }
  0x21   : > { %s870_s6 = sshll.u32 %s121_s3, 4  ;;  %s532_s7 = sshll.u32 %s1172_s26, 10  ;;  %s139_s6 = int_to_ptr.vmem [resolvable:$true] %s870_s6 }
  0x22   : > { %s134_s16 = scalar_lea.hbm %s1154_s0, %s559_s5  ;;  %s613_s24 = sshrl.u32 %s532_s7, 4 }
  0x23   : > { %s136_s17 = sshll.u32 %s134_s16, 4  ;;  %s622_s29 = scalar_lea.hbm %s1154_s0, 576  ;;  %s877_s17 = int_to_ptr.hbm [resolvable:$true] %s136_s17 }
  0x24   : > { %s611_s23 = sshra.s32 %s877_s17, 4  ;;  %s612_s23 = int_to_ptr.hbm [resolvable:$true] %s611_s23 }
  0x25   : > { %s618_s25 = scalar_lea.hbm %s612_s23, %s613_s24  ;;  %p623_p3 = scmp.lt.s32.totalorder %s612_s23, %s1154_s0 }
  0x26   : > { %p619_p0 = scmp.ne.s32.totalorder %s612_s23, %s618_s25  ;;  %p624_p4 = scmp.lt.s32.totalorder %s622_s29, %s618_s25 }
  0x28   : > { %p620_p1 = pnand %p619_p0, %p865_p13  ;;  %p625_p7 = por %p624_p4, %p623_p3 }
  0x2a   : > { %p621_p2 = pneg %p620_p1 }
  0x2c   : > { %p626_p8 = pnand %p625_p7, %p621_p2 }
  0x2e   : > { %629 = shalt.err (!%p626_p8)
}
  0x2f   : > { %s630_s8 = sshra.s32 %s139_s6, 4  ;;  %s772_s16 = smov [#allocation2]   ;;  %s631_s8 = int_to_ptr.vmem [resolvable:$true] %s630_s8 }
  0x30   : > { %s637_s14 = scalar_lea.vmem %s631_s8, %s613_s24  ;;  %s641_s27 = scalar_lea.vmem %s772_s16, 640 }
  0x31   : > { %p638_p12 = scmp.ne.s32.totalorder %s631_s8, %s637_s14  ;;  %p643_p11 = scmp.lt.s32.totalorder %s641_s27, %s637_s14 }
  0x33   : > { %p639_p0 = pnand %p638_p12, %p865_p13 }
  0x35   : > { %p640_p1 = pneg %p639_p0 }
  0x37   : > { %p645_p10 = pnand %p643_p11, %p640_p1 }
  0x39   : > { %648 = shalt.err (!%p645_p10)
}
  0x3a   : > { %s773_s23 = smov 1024   ;;  %s774_s25 = smov 64  }
  0x3b   : > { %144 = dma.hbm_to_vmem [thread:$0]  (%p865_p13), %s877_s17, %s532_s7, %s139_s6, %s862_s30, %s773_s23, %s773_s23, %s774_s25  }
  0x3c PF: > { %147 = sbr.rel (!%p835_p5) target bundleno = 98 (0x62), region = 24  ;;  %s148_s24 = sand.u32 (%p835_p5), 1, %s766_s11  }
  0x3d   : > { %s153_s28 = smul.u32 (%p835_p5), 5, %s770_s12  ;;  %s909_s14 = scalar_lea.sflag (%p835_p5), [#allocation6], %s148_s24 }
  0x3e   : > { %s563_s29 = smul.u32 (%p835_p5), 320, %s148_s24 }
  0x3f   : > { %s154_s3 = ssub.s32 (%p835_p5), 9, %s153_s28 }
  0x40   : > { %p155_p10 = scmp.lt.s32.totalorder (%p835_p5), %s154_s3, 5  ;;  %s152_s26 = scalar_lea.vmem (%p835_p5), [#allocation5], %s563_s29 }
  0x42   : > { %s1174_s3 = smov (!%p155_p10, %s154_s3), 5 }
  0x43   : > { %s553_s5 = sshll.u32 %s1174_s3, 6 }
  0x44   : > { %s159_s8 = ssub.s32 320, %s553_s5 }
  0x45   : > { %s160_s4 = sshll.u32 %s159_s8, 4 }
  0x46   : > { %161 = vsyncadd %s909_s14, %s160_s4  ;;  %p912_p5 = scmp.ne.s32.totalorder %s553_s5, 0  ;;  %s560_s30 = smul.u32 320, %s770_s12 }
  0x47   : > { %s917_s6 = sshll.u32 %s152_s26, 4  ;;  %s539_s7 = sshll.u32 %s1174_s3, 10  ;;  %s170_s6 = int_to_ptr.vmem [resolvable:$true] %s917_s6 }
  0x48   : > { %s165_s27 = scalar_lea.hbm %s1155_s1, %s560_s30  ;;  %s652_s24 = sshrl.u32 %s539_s7, 4 }
  0x49   : > { %s167_s23 = sshll.u32 %s165_s27, 4  ;;  %s661_s8 = scalar_lea.hbm %s1155_s1, 576  ;;  %s924_s23 = int_to_ptr.hbm [resolvable:$true] %s167_s23 }
  0x4a   : > { %s650_s25 = sshra.s32 %s924_s23, 4  ;;  %s651_s25 = int_to_ptr.hbm [resolvable:$true] %s650_s25 }
  0x4b   : > { %s657_s28 = scalar_lea.hbm %s651_s25, %s652_s24  ;;  %p662_p3 = scmp.lt.s32.totalorder %s651_s25, %s1155_s1 }
  0x4c   : > { %p658_p11 = scmp.ne.s32.totalorder %s651_s25, %s657_s28  ;;  %p663_p4 = scmp.lt.s32.totalorder %s661_s8, %s657_s28 }
  0x4e   : > { %p659_p13 = pnand %p658_p11, %p912_p5  ;;  %p664_p7 = por %p663_p4, %p662_p3 }
  0x50   : > { %p660_p2 = pneg %p659_p13 }
  0x52   : > { %p665_p8 = pnand %p664_p7, %p660_p2 }
  0x54   : > { %668 = shalt.err (!%p665_p8)
}
  0x55   : > { %s669_s30 = sshra.s32 %s170_s6, 4  ;;  %s775_s16 = smov [#allocation5]   ;;  %s670_s30 = int_to_ptr.vmem [resolvable:$true] %s669_s30 }
  0x56   : > { %s676_s17 = scalar_lea.vmem %s670_s30, %s652_s24  ;;  %s680_s27 = scalar_lea.vmem %s775_s16, 640 }
  0x57   : > { %p677_p12 = scmp.ne.s32.totalorder %s670_s30, %s676_s17  ;;  %p682_p10 = scmp.lt.s32.totalorder %s680_s27, %s676_s17 }
  0x59   : > { %p678_p0 = pnand %p677_p12, %p912_p5 }
  0x5b   : > { %p679_p1 = pneg %p678_p0 }
  0x5d   : > { %p684_p11 = pnand %p682_p10, %p679_p1 }
  0x5f   : > { %687 = shalt.err (!%p684_p11)
}
  0x60   : > { %s776_s25 = smov 1024   ;;  %s777_s28 = smov 64  }
  0x61   : > { %175 = dma.hbm_to_vmem [thread:$0]  (%p912_p5), %s924_s23, %s539_s7, %s170_s6, %s909_s14, %s776_s25, %s776_s25, %s777_s28  }
  0x62 PF: > { %p540_p13 = scmp.ge.s32.totalorder %s770_s12, 1  ;;  %p177_p2 = scmp.lt.s32.totalorder %s770_s12, 3 }
  0x64   : > { %p178_p3 = pnand %p540_p13, %p177_p2 }
  0x65   : > { %s952_s24 = sand.u32 (!%p178_p3), 1, %s762_s10  }
  0x66   : > { %181 = sbr.rel (%p178_p3) target bundleno = 185 (0xb9), region = 28  ;;  %s184_s5 = scalar_lea.sflag (!%p178_p3), [#allocation3], %s952_s24 }
  0x67   : > { %s564_s29 = smul.u32 (!%p178_p3), 320, %s952_s24 }
  0x69   : > { %s956_s19 = scalar_lea.vmem (!%p178_p3), [#allocation2], %s564_s29 }
  0x6b   : > { %745 = dma.done.wait (%p839_p6), %s184_s5, 5120  }
  0x6c   : > { %747 = vsyncadd (%p839_p6), %s184_s5, 4294962176  ;;  %s194_s3 = scalar_lea.sflag [#allocation6], %s952_s24  ;;  %s963_s14 = scalar_lea.vmem [#allocation5], %s564_s29 }
  0x6d   : > { %749 = dma.done.wait (%p839_p6), %s194_s3, 5120  }
  0x6e   : > { %751 = vsyncadd (%p839_p6), %s194_s3, 4294962176  ;;  %v242_v0 = vld [vmem:[%s956_s19] sm:$0xff]  ;;  %v243_v2 = vld [vmem:[%s956_s19 + $0x8] sm:$0xff]  ;;  %s978_s20 = scalar_lea.vmem [#allocation7], %s564_s29  ;;  %s403_s6 = scalar_lea.sflag [#allocation4], %s952_s24 }
  0x6f   : > { %v282_v1 = vld [vmem:[%s963_s14] sm:$0xff]  ;;  %v283_v4 = vld [vmem:[%s963_s14 + $0x8] sm:$0xff]  ;;  %v244_v5 = vld [vmem:[%s956_s19 + $0x10] sm:$0xff]  ;;  %s410_s7 = smul.u32 (%p844_p9), 5, %s817_s13 }
  0x70   : > { %v322_v3 = vadd.f32 %v282_v1, %v242_v0  ;;  %v284_v6 = vld [vmem:[%s963_s14 + $0x10] sm:$0xff]  ;;  %v323_v7 = vadd.f32 %v283_v4, %v243_v2  ;;  %v245_v9 = vld [vmem:[%s956_s19 + $0x18] sm:$0xff]  ;;  %v246_v11 = vld [vmem:[%s956_s19 + $0x20] sm:$0xff] }
  0x71   : > { %v324_v8 = vadd.f32 %v284_v6, %v244_v5  ;;  %v285_v10 = vld [vmem:[%s963_s14 + $0x18] sm:$0xff]  ;;  %v286_v13 = vld [vmem:[%s963_s14 + $0x20] sm:$0xff]  ;;  %v247_v14 = vld [vmem:[%s956_s19 + $0x28] sm:$0xff]  ;;  %s411_s23 = ssub.s32 (%p844_p9), 9, %s410_s7 }
  0x72   : > { %362 = vst [vmem:[%s978_s20] sm:$0xff] %v322_v3  ;;  %v325_v12 = vadd.f32 %v285_v10, %v245_v9  ;;  %v287_v15 = vld [vmem:[%s963_s14 + $0x28] sm:$0xff]  ;;  %v326_v16 = vadd.f32 %v286_v13, %v246_v11  ;;  %v248_v18 = vld [vmem:[%s956_s19 + $0x30] sm:$0xff]  ;;  %v249_v20 = vld [vmem:[%s956_s19 + $0x38] sm:$0xff]  ;;  %p412_p6 = scmp.lt.s32.totalorder (%p844_p9), %s411_s23, 5 }
  0x73   : > { %363 = vst [vmem:[%s978_s20 + $0x8] sm:$0xff] %v323_v7  ;;  %v327_v17 = vadd.f32 %v287_v15, %v247_v14  ;;  %v288_v19 = vld [vmem:[%s963_s14 + $0x30] sm:$0xff]  ;;  %v289_v22 = vld [vmem:[%s963_s14 + $0x38] sm:$0xff]  ;;  %v250_v23 = vld [vmem:[%s956_s19 + $0x40] sm:$0xff] }
  0x74   : > { %364 = vst [vmem:[%s978_s20 + $0x10] sm:$0xff] %v324_v8  ;;  %v328_v21 = vadd.f32 %v288_v19, %v248_v18  ;;  %v290_v24 = vld [vmem:[%s963_s14 + $0x40] sm:$0xff]  ;;  %v329_v25 = vadd.f32 %v289_v22, %v249_v20  ;;  %v251_v26 = vld [vmem:[%s956_s19 + $0x48] sm:$0xff]  ;;  %v252_v28 = vld [vmem:[%s956_s19 + $0x50] sm:$0xff] }
  0x75   : > { %365 = vst [vmem:[%s978_s20 + $0x18] sm:$0xff] %v325_v12  ;;  %v291_v27 = vld [vmem:[%s963_s14 + $0x48] sm:$0xff]  ;;  %v330_v29 = vadd.f32 %v290_v24, %v250_v23  ;;  %v292_v30 = vld [vmem:[%s963_s14 + $0x50] sm:$0xff]  ;;  %v253_v31 = vld [vmem:[%s956_s19 + $0x58] sm:$0xff] }
  0x76   : > { %366 = vst [vmem:[%s978_s20 + $0x20] sm:$0xff] %v326_v16  ;;  %v293_v32 = vld [vmem:[%s963_s14 + $0x58] sm:$0xff]  ;;  %v331_v33 = vadd.f32 %v291_v27, %v251_v26  ;;  %v254_v34 = vld [vmem:[%s956_s19 + $0x60] sm:$0xff]  ;;  %v332_v36 = vadd.f32 %v292_v30, %v252_v28  ;;  %v255_v37 = vld [vmem:[%s956_s19 + $0x68] sm:$0xff] }
  0x77   : > { %367 = vst [vmem:[%s978_s20 + $0x28] sm:$0xff] %v327_v17  ;;  %v294_v35 = vld [vmem:[%s963_s14 + $0x60] sm:$0xff]  ;;  %v295_v38 = vld [vmem:[%s963_s14 + $0x68] sm:$0xff]  ;;  %v333_v39 = vadd.f32 %v293_v32, %v253_v31  ;;  %v256_v40 = vld [vmem:[%s956_s19 + $0x70] sm:$0xff] }
  0x78   : > { %368 = vst [vmem:[%s978_s20 + $0x30] sm:$0xff] %v328_v21  ;;  %v296_v41 = vld [vmem:[%s963_s14 + $0x70] sm:$0xff]  ;;  %v334_v42 = vadd.f32 %v294_v35, %v254_v34  ;;  %v257_v43 = vld [vmem:[%s956_s19 + $0x78] sm:$0xff]  ;;  %v335_v45 = vadd.f32 %v295_v38, %v255_v37  ;;  %v258_v46 = vld [vmem:[%s956_s19 + $0x80] sm:$0xff] }
  0x79   : > { %369 = vst [vmem:[%s978_s20 + $0x38] sm:$0xff] %v329_v25  ;;  %v297_v44 = vld [vmem:[%s963_s14 + $0x78] sm:$0xff]  ;;  %v298_v47 = vld [vmem:[%s963_s14 + $0x80] sm:$0xff]  ;;  %v336_v48 = vadd.f32 %v296_v41, %v256_v40  ;;  %v259_v49 = vld [vmem:[%s956_s19 + $0x88] sm:$0xff] }
  0x7a   : > { %370 = vst [vmem:[%s978_s20 + $0x40] sm:$0xff] %v330_v29  ;;  %v299_v50 = vld [vmem:[%s963_s14 + $0x88] sm:$0xff]  ;;  %v337_v51 = vadd.f32 %v297_v44, %v257_v43  ;;  %v260_v52 = vld [vmem:[%s956_s19 + $0x90] sm:$0xff]  ;;  %v338_v54 = vadd.f32 %v298_v47, %v258_v46  ;;  %v261_v55 = vld [vmem:[%s956_s19 + $0x98] sm:$0xff] }
  0x7b   : > { %371 = vst [vmem:[%s978_s20 + $0x48] sm:$0xff] %v331_v33  ;;  %v300_v53 = vld [vmem:[%s963_s14 + $0x90] sm:$0xff]  ;;  %v301_v56 = vld [vmem:[%s963_s14 + $0x98] sm:$0xff]  ;;  %v339_v57 = vadd.f32 %v299_v50, %v259_v49  ;;  %v262_v58 = vld [vmem:[%s956_s19 + $0xa0] sm:$0xff] }
  0x7c   : > { %372 = vst [vmem:[%s978_s20 + $0x50] sm:$0xff] %v332_v36  ;;  %v302_v59 = vld [vmem:[%s963_s14 + $0xa0] sm:$0xff]  ;;  %v340_v60 = vadd.f32 %v300_v53, %v260_v52  ;;  %v263_v61 = vld [vmem:[%s956_s19 + $0xa8] sm:$0xff]  ;;  %v341_v63 = vadd.f32 %v301_v56, %v261_v55  ;;  %v264_v0 = vld [vmem:[%s956_s19 + $0xb0] sm:$0xff] }
  0x7d   : > { %373 = vst [vmem:[%s978_s20 + $0x58] sm:$0xff] %v333_v39  ;;  %v303_v62 = vld [vmem:[%s963_s14 + $0xa8] sm:$0xff]  ;;  %v304_v1 = vld [vmem:[%s963_s14 + $0xb0] sm:$0xff]  ;;  %v342_v2 = vadd.f32 %v302_v59, %v262_v58  ;;  %v265_v3 = vld [vmem:[%s956_s19 + $0xb8] sm:$0xff] }
  0x7e   : > { %374 = vst [vmem:[%s978_s20 + $0x60] sm:$0xff] %v334_v42  ;;  %v305_v4 = vld [vmem:[%s963_s14 + $0xb8] sm:$0xff]  ;;  %v343_v5 = vadd.f32 %v303_v62, %v263_v61  ;;  %v266_v6 = vld [vmem:[%s956_s19 + $0xc0] sm:$0xff]  ;;  %v344_v8 = vadd.f32 %v304_v1, %v264_v0  ;;  %v267_v9 = vld [vmem:[%s956_s19 + $0xc8] sm:$0xff] }
  0x7f   : > { %375 = vst [vmem:[%s978_s20 + $0x68] sm:$0xff] %v335_v45  ;;  %v306_v7 = vld [vmem:[%s963_s14 + $0xc0] sm:$0xff]  ;;  %v307_v10 = vld [vmem:[%s963_s14 + $0xc8] sm:$0xff]  ;;  %v345_v11 = vadd.f32 %v305_v4, %v265_v3  ;;  %v268_v12 = vld [vmem:[%s956_s19 + $0xd0] sm:$0xff] }
  0x80   : > { %376 = vst [vmem:[%s978_s20 + $0x70] sm:$0xff] %v336_v48  ;;  %v308_v13 = vld [vmem:[%s963_s14 + $0xd0] sm:$0xff]  ;;  %v346_v14 = vadd.f32 %v306_v7, %v266_v6  ;;  %v269_v15 = vld [vmem:[%s956_s19 + $0xd8] sm:$0xff]  ;;  %v347_v17 = vadd.f32 %v307_v10, %v267_v9  ;;  %v270_v18 = vld [vmem:[%s956_s19 + $0xe0] sm:$0xff] }
  0x81   : > { %377 = vst [vmem:[%s978_s20 + $0x78] sm:$0xff] %v337_v51  ;;  %v309_v16 = vld [vmem:[%s963_s14 + $0xd8] sm:$0xff]  ;;  %v310_v19 = vld [vmem:[%s963_s14 + $0xe0] sm:$0xff]  ;;  %v348_v20 = vadd.f32 %v308_v13, %v268_v12  ;;  %v271_v21 = vld [vmem:[%s956_s19 + $0xe8] sm:$0xff] }
  0x82   : > { %378 = vst [vmem:[%s978_s20 + $0x80] sm:$0xff] %v338_v54  ;;  %v311_v22 = vld [vmem:[%s963_s14 + $0xe8] sm:$0xff]  ;;  %v349_v23 = vadd.f32 %v309_v16, %v269_v15  ;;  %v272_v24 = vld [vmem:[%s956_s19 + $0xf0] sm:$0xff]  ;;  %v350_v26 = vadd.f32 %v310_v19, %v270_v18  ;;  %v273_v27 = vld [vmem:[%s956_s19 + $0xf8] sm:$0xff] }
  0x83   : > { %379 = vst [vmem:[%s978_s20 + $0x88] sm:$0xff] %v339_v57  ;;  %v312_v25 = vld [vmem:[%s963_s14 + $0xf0] sm:$0xff]  ;;  %v313_v28 = vld [vmem:[%s963_s14 + $0xf8] sm:$0xff]  ;;  %v351_v29 = vadd.f32 %v311_v22, %v271_v21  ;;  %v274_v30 = vld [vmem:[%s956_s19 + $0x100] sm:$0xff] }
  0x84   : > { %380 = vst [vmem:[%s978_s20 + $0x90] sm:$0xff] %v340_v60  ;;  %v314_v31 = vld [vmem:[%s963_s14 + $0x100] sm:$0xff]  ;;  %v352_v32 = vadd.f32 %v312_v25, %v272_v24  ;;  %v275_v33 = vld [vmem:[%s956_s19 + $0x108] sm:$0xff]  ;;  %v353_v35 = vadd.f32 %v313_v28, %v273_v27  ;;  %v276_v36 = vld [vmem:[%s956_s19 + $0x110] sm:$0xff] }
  0x85   : > { %381 = vst [vmem:[%s978_s20 + $0x98] sm:$0xff] %v341_v63  ;;  %v315_v34 = vld [vmem:[%s963_s14 + $0x108] sm:$0xff]  ;;  %v316_v37 = vld [vmem:[%s963_s14 + $0x110] sm:$0xff]  ;;  %v354_v38 = vadd.f32 %v314_v31, %v274_v30  ;;  %v277_v39 = vld [vmem:[%s956_s19 + $0x118] sm:$0xff] }
  0x86   : > { %382 = vst [vmem:[%s978_s20 + $0xa0] sm:$0xff] %v342_v2  ;;  %v317_v40 = vld [vmem:[%s963_s14 + $0x118] sm:$0xff]  ;;  %v355_v41 = vadd.f32 %v315_v34, %v275_v33  ;;  %v278_v42 = vld [vmem:[%s956_s19 + $0x120] sm:$0xff]  ;;  %v356_v44 = vadd.f32 %v316_v37, %v276_v36  ;;  %v279_v45 = vld [vmem:[%s956_s19 + $0x128] sm:$0xff] }
  0x87   : > { %383 = vst [vmem:[%s978_s20 + $0xa8] sm:$0xff] %v343_v5  ;;  %v318_v43 = vld [vmem:[%s963_s14 + $0x120] sm:$0xff]  ;;  %v319_v46 = vld [vmem:[%s963_s14 + $0x128] sm:$0xff]  ;;  %v357_v47 = vadd.f32 %v317_v40, %v277_v39  ;;  %v280_v48 = vld [vmem:[%s956_s19 + $0x130] sm:$0xff] }
  0x88   : > { %384 = vst [vmem:[%s978_s20 + $0xb0] sm:$0xff] %v344_v8  ;;  %v320_v49 = vld [vmem:[%s963_s14 + $0x130] sm:$0xff]  ;;  %v358_v50 = vadd.f32 %v318_v43, %v278_v42  ;;  %v281_v51 = vld [vmem:[%s956_s19 + $0x138] sm:$0xff]  ;;  %v359_v53 = vadd.f32 %v319_v46, %v279_v45 }
  0x89   : > { %385 = vst [vmem:[%s978_s20 + $0xb8] sm:$0xff] %v345_v11  ;;  %v321_v52 = vld [vmem:[%s963_s14 + $0x138] sm:$0xff]  ;;  %v360_v54 = vadd.f32 %v320_v49, %v280_v48 }
  0x8a   : > { %386 = vst [vmem:[%s978_s20 + $0xc0] sm:$0xff] %v346_v14  ;;  %v361_v55 = vadd.f32 %v321_v52, %v281_v51 }
  0x8b   : > { %387 = vst [vmem:[%s978_s20 + $0xc8] sm:$0xff] %v347_v17 }
  0x8c   : > { %388 = vst [vmem:[%s978_s20 + $0xd0] sm:$0xff] %v348_v20 }
  0x8d   : > { %389 = vst [vmem:[%s978_s20 + $0xd8] sm:$0xff] %v349_v23 }
  0x8e   : > { %390 = vst [vmem:[%s978_s20 + $0xe0] sm:$0xff] %v350_v26 }
  0x8f   : > { %391 = vst [vmem:[%s978_s20 + $0xe8] sm:$0xff] %v351_v29 }
  0x90   : > { %392 = vst [vmem:[%s978_s20 + $0xf0] sm:$0xff] %v352_v32 }
  0x91   : > { %393 = vst [vmem:[%s978_s20 + $0xf8] sm:$0xff] %v353_v35 }
  0x92   : > { %394 = vst [vmem:[%s978_s20 + $0x100] sm:$0xff] %v354_v38 }
  0x93   : > { %395 = vst [vmem:[%s978_s20 + $0x108] sm:$0xff] %v355_v41 }
  0x94   : > { %396 = vst [vmem:[%s978_s20 + $0x110] sm:$0xff] %v356_v44 }
  0x95   : > { %397 = vst [vmem:[%s978_s20 + $0x118] sm:$0xff] %v357_v47  ;;  %409 = sbr.rel (!%p844_p9) target bundleno = 185 (0xb9), region = 40 }
  0x96   : > { %398 = vst [vmem:[%s978_s20 + $0x120] sm:$0xff] %v358_v50 }
  0x97   : > { %399 = vst [vmem:[%s978_s20 + $0x128] sm:$0xff] %v359_v53 }
  0x98   : > { %400 = vst [vmem:[%s978_s20 + $0x130] sm:$0xff] %v360_v54 }
  0x99   : > { %401 = vst [vmem:[%s978_s20 + $0x138] sm:$0xff] %v361_v55 }
  0x9a   : > { %s1176_s23 = smov (!%p412_p6, %s411_s23), 5 }
  0x9b   : > { %s556_s8 = sshll.u32 %s1176_s23, 6 }
  0x9c   : > { %s416_s4 = ssub.s32 320, %s556_s8 }
  0x9d   : > { %s417_s26 = sshll.u32 %s416_s4, 4 }
  0x9e   : > { %418 = vsyncadd %s403_s6, %s417_s26  ;;  %p1100_p5 = scmp.ne.s32.totalorder %s556_s8, 0  ;;  %s561_s30 = smul.u32 320, %s817_s13 }
  0x9f   : > { %s424_s17 = sshll.u32 %s978_s20, 4  ;;  %s547_s16 = sshll.u32 %s1176_s23, 10  ;;  %s1110_s17 = int_to_ptr.vmem [resolvable:$true] %s424_s17 }
  0xa0   : > { %s422_s28 = scalar_lea.hbm %s1156_s2, %s561_s30  ;;  %s689_s5 = sshra.s32 %s1110_s17, 4  ;;  %s690_s5 = int_to_ptr.vmem [resolvable:$true] %s689_s5 }
  0xa1   : > { %s426_s29 = sshll.u32 %s422_s28, 4  ;;  %s691_s19 = sshrl.u32 %s547_s16, 4  ;;  %s1112_s29 = int_to_ptr.hbm [resolvable:$true] %s426_s29 }
  0xa2   : > { %s696_s3 = scalar_lea.vmem %s690_s5, %s691_s19  ;;  %s778_s13 = smov [#allocation7]  }
  0xa3   : > { %p697_p9 = scmp.ne.s32.totalorder %s690_s5, %s696_s3  ;;  %s700_s14 = scalar_lea.vmem %s778_s13, 640 }
  0xa4   : > { %p702_p8 = scmp.lt.s32.totalorder %s700_s14, %s696_s3 }
  0xa5   : > { %p698_p4 = pnand %p697_p9, %p1100_p5 }
  0xa7   : > { %p699_p7 = pneg %p698_p4 }
  0xa9   : > { %p704_p12 = pnand %p702_p8, %p699_p7 }
  0xab   : > { %707 = shalt.err (!%p704_p12)
}
  0xac   : > { %s708_s20 = sshra.s32 %s1112_s29, 4  ;;  %s719_s26 = scalar_lea.hbm %s1156_s2, 576  ;;  %s709_s20 = int_to_ptr.hbm [resolvable:$true] %s708_s20 }
  0xad   : > { %s715_s7 = scalar_lea.hbm %s709_s20, %s691_s19  ;;  %p720_p11 = scmp.lt.s32.totalorder %s709_s20, %s1156_s2 }
  0xae   : > { %p716_p0 = scmp.ne.s32.totalorder %s709_s20, %s715_s7  ;;  %p721_p13 = scmp.lt.s32.totalorder %s719_s26, %s715_s7 }
  0xb0   : > { %p717_p1 = pnand %p716_p0, %p1100_p5  ;;  %p722_p2 = por %p721_p13, %p720_p11 }
  0xb2   : > { %p718_p10 = pneg %p717_p1 }
  0xb4   : > { %p723_p3 = pnand %p722_p2, %p718_p10 }
  0xb6   : > { %726 = shalt.err (!%p723_p3)
}
  0xb7   : > { %s779_s25 = smov 1024   ;;  %s780_s28 = smov 64  }
  0xb8   : > { %432 = dma.vmem_to_hbm [thread:$0]  (%p1100_p5), %s1110_s17, %s547_s16, %s1112_s29, %s403_s6, %s779_s25, %s779_s25, %s780_s28  }
  0xb9 PF: > { %s441_s5 = sand.u32 1, %s758_s9   ;;  %p1165_p6 = scmp.ne.s32.totalorder %s1161_s22, 0 }
  0xba   : > { %p1166_p9 = scmp.ge.s32.totalorder %s770_s12, 2  ;;  %s442_s19 = scalar_lea.sflag [#allocation4], %s441_s5 }
  0xbc   : > { %p569_p4 = pnand %p1166_p9, %p1165_p6 }
  0xbe   : > { %p570_p7 = pneg %p569_p4 }
  0xc0   : > { %753 = dma.done.wait (%p570_p7), %s442_s19, 5120  }
  0xc1   : > { %755 = vsyncadd (%p570_p7), %s442_s19, 4294962176  ;;  %p18_p8 = scmp.ge.s32.totalorder %s821_s15, 4   ;;  %s1167_s9 = smov %s762_s10 }
  0xc2   : > { %s1168_s10 = smov %s766_s11  ;;  %s1169_s11 = smov %s833_s18 }
  0xc3   : > { %s1170_s12 = smov %s821_s15  ;;  %20 = sbr.rel (!%p18_p8) target bundleno = 7 (0x7), region = 86 }
  0xc8   :  { %448 = vsyncpa [#allocation3], 1 }
  0xc9   :  { %450 = vsyncpa [#allocation3 + $0x1], 1 }
  0xca   :  { %451 = vsyncpa [#allocation6], 1 }
  0xcb   :  { %453 = vsyncpa [#allocation6 + $0x1], 1 }
  0xcc   :  { %454 = vsyncpa [#allocation4], 1 }
  0xcd   :  { %456 = vsyncpa [#allocation4 + $0x1], 1 }

</bundles_post_ra>
